<compile_context>
chip_gen: v7x
topology: tpu7x:2x2x1
jax: 0.10.0
libtpu: 0.0.40
codegen_flags: <defaults>
</compile_context>

<pallas_src>
import jax
import jax.numpy as jnp
from jax.experimental import pallas as pl
from jax.experimental.pallas import tpu as pltpu

HIDDEN = 10
LANES = 128
SUBLANES = 8


def net_kernel(params_ref, x_ref, o_ref):
    # params_ref: SMEM (2*HIDDEN + 2,) f32, packed as [e_0..e_9 | g_0..g_9 | A | C].
    # x_ref / o_ref: VMEM (tile_rows, 128) lane-dense slabs of the flat input.
    x = x_ref[...]
    acc = x * params_ref[2 * HIDDEN] + params_ref[2 * HIDDEN + 1]        # A*x + C
    for j in range(HIDDEN):                                              # unrolled VPU loop
        acc = acc + jnp.abs(x + params_ref[j]) * params_ref[HIDDEN + j]  # += g_j*|x + e_j|
    o_ref[...] = acc


def _fold_params(w1, b1, w2, b2):
    """Fold ReLU + second linear into y = A*x + C + sum_j g_j*|x + e_j| (plain JAX)."""
    w1f = w1.reshape(-1).astype(jnp.float32)   # (HIDDEN,)
    b1f = b1.reshape(-1).astype(jnp.float32)
    w2f = w2.reshape(-1).astype(jnp.float32)
    b2s = b2.reshape(-1).astype(jnp.float32)[0]

    nonzero = w1f != 0.0
    # Units with w1_j == 0 are constants: w2_j * relu(b1_j) folded into C.
    a = 0.5 * jnp.sum(jnp.where(nonzero, w2f * w1f, 0.0))
    c = (b2s
         + 0.5 * jnp.sum(jnp.where(nonzero, w2f * b1f, 0.0))
         + jnp.sum(jnp.where(nonzero, 0.0, w2f * jnp.maximum(b1f, 0.0))))
    g = jnp.where(nonzero, 0.5 * jnp.abs(w1f) * w2f, 0.0)
    e = jnp.where(nonzero, b1f / jnp.where(nonzero, w1f, 1.0), 0.0)

    return jnp.concatenate([e, g, jnp.stack([a, c])]).astype(jnp.float32)


def net_forward(x, w1, b1, w2, b2, *, tile_rows=1024):
    """Forward pass of Linear(1,10) -> ReLU -> Linear(10,1). x: (N, 1) float32."""
    N = x.shape[0]
    params = _fold_params(w1, b1, w2, b2)

    # Lane-dense layout: pad N only up to one vreg tile (8*128 = 1024 elements).
    vreg_elems = SUBLANES * LANES
    n_pad = pl.cdiv(N, vreg_elems) * vreg_elems
    x_flat = x.reshape(-1).astype(jnp.float32)
    if n_pad != N:
        x_flat = jnp.pad(x_flat, (0, n_pad - N))   # tail-only pad (skipped if aligned)
    rows = n_pad // LANES                          # multiple of 8
    x2d = x_flat.reshape(rows, LANES)

    # Tile choice: large tiles to amortize grid-step overhead, but guarantee
    # >= 2 grid steps for mid/large batches so v7x's second TC gets work.
    tile_rows = min(tile_rows, rows)
    if rows >= 2 * SUBLANES and rows // tile_rows < 2:
        tile_rows = max(SUBLANES, (rows // 2) // SUBLANES * SUBLANES)
    grid = (pl.cdiv(rows, tile_rows),)             # ragged last block is masked by Pallas

    out2d = pl.pallas_call(
        net_kernel,
        out_shape=jax.ShapeDtypeStruct((rows, LANES), jnp.float32),
        grid=grid,
        in_specs=[
            pl.BlockSpec(memory_space=pltpu.MemorySpace.SMEM),   # packed folded params
            pl.BlockSpec((tile_rows, LANES), lambda i: (i, 0)),  # x tile
        ],
        out_specs=pl.BlockSpec((tile_rows, LANES), lambda i: (i, 0)),
        compiler_params=pltpu.CompilerParams(
            dimension_semantics=("parallel",),
        ),
    )(params, x2d)

    # Restore the (N, 1) PyTorch layout; avoid the slice copy when already aligned.
    out_flat = out2d.reshape(-1)
    if n_pad != N:
        out_flat = out_flat[:N]
    return out_flat.reshape(N, 1)


def init_params(key):
    # Shapes match the PyTorch module (weights stored transposed, i.e. x @ W + b):
    #   hidden:  Linear(1, 10)  -> W1 (1, 10), b1 (1, 10)
    #   predict: Linear(10, 1)  -> W2 (10, 1), b2 (1, 1)
    k1, k2, k3, k4 = jax.random.split(key, 4)
    bound1 = 1.0 / jnp.sqrt(1.0)    # PyTorch default: U(-1/sqrt(fan_in), 1/sqrt(fan_in))
    bound2 = 1.0 / jnp.sqrt(10.0)
    w1 = jax.random.uniform(k1, (1, 10), jnp.float32, -bound1, bound1)
    b1 = jax.random.uniform(k2, (1, 10), jnp.float32, -bound1, bound1)
    w2 = jax.random.uniform(k3, (10, 1), jnp.float32, -bound2, bound2)
    b2 = jax.random.uniform(k4, (1, 1), jnp.float32, -bound2, bound2)
    return w1, b1, w2, b2


if __name__ == "__main__":
    key = jax.random.PRNGKey(0)
    k_x, k_p = jax.random.split(key)

    # Small regression batch: (N, 1) input, like torch.unsqueeze(torch.linspace(...)).
    N = 64
    x = jax.random.uniform(k_x, (N, 1), jnp.float32, -1.0, 1.0)

    w1, b1, w2, b2 = init_params(k_p)

    y = net_forward(x, w1, b1, w2, b2)
    y = jax.block_until_ready(y)

    # Reference check in plain JAX (same math as the PyTorch forward pass).
    y_ref = jnp.maximum(x @ w1 + b1, 0.0) @ w2 + b2
    assert y.shape == (N, 1)
    assert jnp.allclose(y, y_ref, atol=1e-5, rtol=1e-5), float(jnp.max(jnp.abs(y - y_ref)))

    print("KERNEL_OK")
</pallas_src>

<mosaic_0001>
module attributes {stable_mosaic.version = 11 : i64} {
  func.func @net_kernel(%arg0: i32, %arg1: memref<22xf32, #tpu.memory_space<smem>>, %arg2: memref<8x128xf32, #tpu.memory_space<vmem>>, %arg3: memref<8x128xf32, #tpu.memory_space<vmem>>) attributes {dimension_semantics = [#tpu.dimension_semantics<parallel>], iteration_bounds = array<i64: 1>, scalar_prefetch = 0 : i64, scratch_operands = 0 : i64, tpu.core_type = #tpu.core_type<tc>, window_params = [{transform_indices = @transform_0, window_bounds = array<i64: 22>}, {transform_indices = @transform_1, window_bounds = array<i64: 8, 128>}, {transform_indices = @transform_2, window_bounds = array<i64: 8, 128>}]} {
    %c0 = arith.constant 0 : index
    %c0_0 = arith.constant 0 : index
    %0 = vector.load %arg2[%c0, %c0_0] : memref<8x128xf32, #tpu.memory_space<vmem>>, vector<8x128xf32>
    %c20 = arith.constant 20 : index
    %1 = memref.load %arg1[%c20] : memref<22xf32, #tpu.memory_space<smem>>
    %2 = vector.broadcast %1 : f32 to vector<8x128xf32>
    %3 = arith.mulf %0, %2 : vector<8x128xf32>
    %c21 = arith.constant 21 : index
    %4 = memref.load %arg1[%c21] : memref<22xf32, #tpu.memory_space<smem>>
    %5 = vector.broadcast %4 : f32 to vector<8x128xf32>
    %6 = arith.addf %3, %5 : vector<8x128xf32>
    %c0_1 = arith.constant 0 : index
    %7 = memref.load %arg1[%c0_1] : memref<22xf32, #tpu.memory_space<smem>>
    %8 = vector.broadcast %7 : f32 to vector<8x128xf32>
    %9 = arith.addf %0, %8 : vector<8x128xf32>
    %10 = math.absf %9 : vector<8x128xf32>
    %c10 = arith.constant 10 : index
    %11 = memref.load %arg1[%c10] : memref<22xf32, #tpu.memory_space<smem>>
    %12 = vector.broadcast %11 : f32 to vector<8x128xf32>
    %13 = arith.mulf %10, %12 : vector<8x128xf32>
    %14 = arith.addf %6, %13 : vector<8x128xf32>
    %c1 = arith.constant 1 : index
    %15 = memref.load %arg1[%c1] : memref<22xf32, #tpu.memory_space<smem>>
    %16 = vector.broadcast %15 : f32 to vector<8x128xf32>
    %17 = arith.addf %0, %16 : vector<8x128xf32>
    %18 = math.absf %17 : vector<8x128xf32>
    %c11 = arith.constant 11 : index
    %19 = memref.load %arg1[%c11] : memref<22xf32, #tpu.memory_space<smem>>
    %20 = vector.broadcast %19 : f32 to vector<8x128xf32>
    %21 = arith.mulf %18, %20 : vector<8x128xf32>
    %22 = arith.addf %14, %21 : vector<8x128xf32>
    %c2 = arith.constant 2 : index
    %23 = memref.load %arg1[%c2] : memref<22xf32, #tpu.memory_space<smem>>
    %24 = vector.broadcast %23 : f32 to vector<8x128xf32>
    %25 = arith.addf %0, %24 : vector<8x128xf32>
    %26 = math.absf %25 : vector<8x128xf32>
    %c12 = arith.constant 12 : index
    %27 = memref.load %arg1[%c12] : memref<22xf32, #tpu.memory_space<smem>>
    %28 = vector.broadcast %27 : f32 to vector<8x128xf32>
    %29 = arith.mulf %26, %28 : vector<8x128xf32>
    %30 = arith.addf %22, %29 : vector<8x128xf32>
    %c3 = arith.constant 3 : index
    %31 = memref.load %arg1[%c3] : memref<22xf32, #tpu.memory_space<smem>>
    %32 = vector.broadcast %31 : f32 to vector<8x128xf32>
    %33 = arith.addf %0, %32 : vector<8x128xf32>
    %34 = math.absf %33 : vector<8x128xf32>
    %c13 = arith.constant 13 : index
    %35 = memref.load %arg1[%c13] : memref<22xf32, #tpu.memory_space<smem>>
    %36 = vector.broadcast %35 : f32 to vector<8x128xf32>
    %37 = arith.mulf %34, %36 : vector<8x128xf32>
    %38 = arith.addf %30, %37 : vector<8x128xf32>
    %c4 = arith.constant 4 : index
    %39 = memref.load %arg1[%c4] : memref<22xf32, #tpu.memory_space<smem>>
    %40 = vector.broadcast %39 : f32 to vector<8x128xf32>
    %41 = arith.addf %0, %40 : vector<8x128xf32>
    %42 = math.absf %41 : vector<8x128xf32>
    %c14 = arith.constant 14 : index
    %43 = memref.load %arg1[%c14] : memref<22xf32, #tpu.memory_space<smem>>
    %44 = vector.broadcast %43 : f32 to vector<8x128xf32>
    %45 = arith.mulf %42, %44 : vector<8x128xf32>
    %46 = arith.addf %38, %45 : vector<8x128xf32>
    %c5 = arith.constant 5 : index
    %47 = memref.load %arg1[%c5] : memref<22xf32, #tpu.memory_space<smem>>
    %48 = vector.broadcast %47 : f32 to vector<8x128xf32>
    %49 = arith.addf %0, %48 : vector<8x128xf32>
    %50 = math.absf %49 : vector<8x128xf32>
    %c15 = arith.constant 15 : index
    %51 = memref.load %arg1[%c15] : memref<22xf32, #tpu.memory_space<smem>>
    %52 = vector.broadcast %51 : f32 to vector<8x128xf32>
    %53 = arith.mulf %50, %52 : vector<8x128xf32>
    %54 = arith.addf %46, %53 : vector<8x128xf32>
    %c6 = arith.constant 6 : index
    %55 = memref.load %arg1[%c6] : memref<22xf32, #tpu.memory_space<smem>>
    %56 = vector.broadcast %55 : f32 to vector<8x128xf32>
    %57 = arith.addf %0, %56 : vector<8x128xf32>
    %58 = math.absf %57 : vector<8x128xf32>
    %c16 = arith.constant 16 : index
    %59 = memref.load %arg1[%c16] : memref<22xf32, #tpu.memory_space<smem>>
    %60 = vector.broadcast %59 : f32 to vector<8x128xf32>
    %61 = arith.mulf %58, %60 : vector<8x128xf32>
    %62 = arith.addf %54, %61 : vector<8x128xf32>
    %c7 = arith.constant 7 : index
    %63 = memref.load %arg1[%c7] : memref<22xf32, #tpu.memory_space<smem>>
    %64 = vector.broadcast %63 : f32 to vector<8x128xf32>
    %65 = arith.addf %0, %64 : vector<8x128xf32>
    %66 = math.absf %65 : vector<8x128xf32>
    %c17 = arith.constant 17 : index
    %67 = memref.load %arg1[%c17] : memref<22xf32, #tpu.memory_space<smem>>
    %68 = vector.broadcast %67 : f32 to vector<8x128xf32>
    %69 = arith.mulf %66, %68 : vector<8x128xf32>
    %70 = arith.addf %62, %69 : vector<8x128xf32>
    %c8 = arith.constant 8 : index
    %71 = memref.load %arg1[%c8] : memref<22xf32, #tpu.memory_space<smem>>
    %72 = vector.broadcast %71 : f32 to vector<8x128xf32>
    %73 = arith.addf %0, %72 : vector<8x128xf32>
    %74 = math.absf %73 : vector<8x128xf32>
    %c18 = arith.constant 18 : index
    %75 = memref.load %arg1[%c18] : memref<22xf32, #tpu.memory_space<smem>>
    %76 = vector.broadcast %75 : f32 to vector<8x128xf32>
    %77 = arith.mulf %74, %76 : vector<8x128xf32>
    %78 = arith.addf %70, %77 : vector<8x128xf32>
    %c9 = arith.constant 9 : index
    %79 = memref.load %arg1[%c9] : memref<22xf32, #tpu.memory_space<smem>>
    %80 = vector.broadcast %79 : f32 to vector<8x128xf32>
    %81 = arith.addf %0, %80 : vector<8x128xf32>
    %82 = math.absf %81 : vector<8x128xf32>
    %c19 = arith.constant 19 : index
    %83 = memref.load %arg1[%c19] : memref<22xf32, #tpu.memory_space<smem>>
    %84 = vector.broadcast %83 : f32 to vector<8x128xf32>
    %85 = arith.mulf %82, %84 : vector<8x128xf32>
    %86 = arith.addf %78, %85 : vector<8x128xf32>
    %c0_2 = arith.constant 0 : index
    %c0_3 = arith.constant 0 : index
    %87 = vector.load %arg3[%c0_2, %c0_3] : memref<8x128xf32, #tpu.memory_space<vmem>>, vector<8x128xf32>
    tpu.vector_store %arg3[%c0_2, %c0_3], %86 {strides = array<i32>} : memref<8x128xf32, #tpu.memory_space<vmem>>, vector<8x128xf32>,
    return
  }
  func.func @transform_0(%arg0: i32) -> i32 {
    %c0_i32 = arith.constant 0 : i32
    %c0_i32_0 = arith.constant 0 : i32
    return %c0_i32 : i32
  }
  func.func @transform_1(%arg0: i32) -> (i32, i32) {
    %c0_i32 = arith.constant 0 : i32
    %c0_i32_0 = arith.constant 0 : i32
    return %arg0, %c0_i32 : i32, i32
  }
  func.func @transform_2(%arg0: i32) -> (i32, i32) {
    %c0_i32 = arith.constant 0 : i32
    %c0_i32_0 = arith.constant 0 : i32
    return %arg0, %c0_i32 : i32, i32
  }
}

</mosaic_0001>

<bundles_post_ra>
// kernel: tpu_custom_call.1
= control target key start
LH: loop header
LB: loop body
LE: loop exit
PB: predicated region body
PF: predicated region fallthrough
CT: control target
= control target key end

     0   :  { %7 = vsyncpa [#allocation5], 0  ;;  %s316_s0 = inlined_call_operand.hbm [shape: f32[22], index: 0, kind: input, shape index: {}]   ;;  %s317_s1 = inlined_call_operand.hbm [shape: f32[8,128], index: 1, kind: input, shape index: {}]   ;;  %s318_s2 = inlined_call_operand.hbm [shape: f32[8,128], index: 2, kind: output, shape index: {}]  }
   0x1   :  { %8 = vsyncpa [#allocation3], 0 }
   0x2   :  { %9 = vsyncpa [#allocation4], 0  ;;  %s163_s11 = scalar_lea.hbm %s316_s0, 16 }
   0x3   :  { %p164_p0 = scmp.ne.s32.totalorder %s316_s0, %s163_s11  ;;  %p167_p1 = scmp.lt.u32.totalorder %s163_s11, %s316_s0 }
   0x5   :  { %p169_p2 = pnand %p167_p1, %p164_p0 }
   0x7   :  { %172 = shalt.err (!%p169_p2)
}
   0x8   :  { %s223_s16 = smov [#allocation2]   ;;  %s224_s19 = smov [#allocation6]  }
   0x9   :  { %17 = dma.hbm_to_smem %s316_s0, 16, %s223_s16, [#allocation5]  }
   0xa   :  { %s24_s20 = sshll.u32 %s224_s19, 4  ;;  %s173_s23 = scalar_lea.hbm %s317_s1, 128  ;;  %s25_s20 = int_to_ptr.vmem [resolvable:$true] %s24_s20 }
   0xb   :  { %p174_p3 = scmp.ne.s32.totalorder %s317_s1, %s173_s23  ;;  %p177_p4 = scmp.lt.u32.totalorder %s173_s23, %s317_s1 }
   0xd   :  { %p179_p5 = pnand %p177_p4, %p174_p3 }
   0xf   :  { %182 = shalt.err (!%p179_p5)
}
  0x10   :  { %s183_s28 = scalar_lea.vmem %s25_s20, 128  ;;  %p188_p7 = scmp.lt.s32.totalorder %s25_s20, %s25_s20 }
  0x11   :  { %p184_p6 = scmp.ne.s32.totalorder %s25_s20, %s183_s28  ;;  %p189_p8 = scmp.lt.s32.totalorder %s183_s28, %s183_s28 }
  0x13   :  { %p190_p9 = por %p189_p8, %p188_p7 }
  0x15   :  { %p191_p10 = pnand %p190_p9, %p184_p6 }
  0x17   :  { %194 = shalt.err (!%p191_p10)
}
  0x18   :  { %27 = dma.hbm_to_vmem [thread:$0]  %s317_s1, 128, %s25_s20, [#allocation3]  }
  0x19   :  { %217 = dma.done.wait [#allocation5], 16  }
  0x1a   :  { %218 = vsyncadd [#allocation5], 4294967280 }
  0x1b   :  { %219 = dma.done.wait [#allocation3], 128  }
  0x1c   :  { %220 = vsyncadd [#allocation3], 4294967168 }
  0x1d   :  { %34 = sfence }
  0x1e   :  { %s139_s30 = sld [smem:[#allocation2 + $0x14]]  ;;  %s140_s3 = sld [smem:[#allocation2 + $0x15]]  ;;  %v35_v0 = vld [vmem:[#allocation6] sm:$0xff] }
  0x1f   :  { %s42_s4 = sld [smem:[#allocation2]]  ;;  %s265_s5 = sld [smem:[#allocation2 + $0xa]] }
  0x20   :  { %s142_s6 = sld [smem:[#allocation2 + $0x1]]  ;;  %s267_s7 = sld [smem:[#allocation2 + $0xb]] }
  0x21   :  { %s144_s8 = sld [smem:[#allocation2 + $0x2]]  ;;  %s269_s9 = sld [smem:[#allocation2 + $0xc]] }
  0x22   :  { %s146_s10 = sld [smem:[#allocation2 + $0x3]]  ;;  %s271_s11 = sld [smem:[#allocation2 + $0xd]] }
  0x23   :  { %s148_s1 = sld [smem:[#allocation2 + $0x4]]  ;;  %s273_s12 = sld [smem:[#allocation2 + $0xe]] }
  0x24   :  { %v37_v1 = vstv %s139_s30  ;;  %v40_v2 = vstv %s140_s3  ;;  %s275_s13 = sld [smem:[#allocation2 + $0x5]]  ;;  %s277_s14 = sld [smem:[#allocation2 + $0x6]] }
  0x25   :  { %v38_v3 = vmul.f32 %v37_v1, %v35_v0  ;;  %v43_v4 = vstv %s42_s4  ;;  %v47_v6 = vstv %s265_s5  ;;  %s280_s15 = sld [smem:[#allocation2 + $0x7]]  ;;  %s285_s17 = sld [smem:[#allocation2 + $0x8]] }
  0x26   :  { %v44_v5 = vadd.f32 %v43_v4, %v35_v0  ;;  %v51_v7 = vstv %s142_s6  ;;  %v55_v10 = vstv %s267_s7  ;;  %s283_s16 = sld [smem:[#allocation2 + $0xf]]  ;;  %s288_s18 = sld [smem:[#allocation2 + $0x9]] }
  0x27   :  { %v41_v8 = vadd.f32 %v40_v2, %v38_v3  ;;  %v52_v9 = vadd.f32 %v51_v7, %v35_v0  ;;  %v59_v11 = vstv %s144_s8  ;;  %v63_v14 = vstv %s269_s9  ;;  %s291_s19 = sld [smem:[#allocation2 + $0x10]]  ;;  %s295_s20 = sld [smem:[#allocation2 + $0x11]] }
  0x28   :  { %v45_v12 = vand.u32 2147483647, %v44_v5  ;;  %v60_v13 = vadd.f32 %v59_v11, %v35_v0  ;;  %v67_v15 = vstv %s146_s10  ;;  %v71_v18 = vstv %s271_s11  ;;  %s157_s21 = sld [smem:[#allocation2 + $0x12]]  ;;  %s159_s22 = sld [smem:[#allocation2 + $0x13]] }
  0x29   :  { %v53_v16 = vand.u32 2147483647, %v52_v9  ;;  %v68_v17 = vadd.f32 %v67_v15, %v35_v0  ;;  %v75_v19 = vstv %s148_s1  ;;  %v79_v26 = vstv %s273_s12  ;;  %s225_s23 = smov [#allocation7]  }
  0x2a   :  { %v48_v20 = vmul.f32 %v47_v6, %v45_v12  ;;  %v61_v21 = vand.u32 2147483647, %v60_v13  ;;  %v76_v22 = vadd.f32 %v75_v19, %v35_v0  ;;  %v83_v23 = vstv %s275_s13  ;;  %s129_s24 = sshll.u32 %s225_s23, 4  ;;  %s130_s24 = int_to_ptr.vmem [resolvable:$true] %s129_s24 }
  0x2b   :  { %v56_v24 = vmul.f32 %v55_v10, %v53_v16  ;;  %v69_v25 = vand.u32 2147483647, %v68_v17  ;;  %v84_v27 = vadd.f32 %v83_v23, %v35_v0  ;;  %v91_v31 = vstv %s277_s14  ;;  %s195_s25 = scalar_lea.vmem %s130_s24, 128  ;;  %p200_p12 = scmp.lt.s32.totalorder %s130_s24, %s130_s24 }
  0x2c   :  { %v49_v28 = vadd.f32 %v48_v20, %v41_v8  ;;  %v64_v29 = vmul.f32 %v63_v14, %v61_v21  ;;  %v77_v30 = vand.u32 2147483647, %v76_v22  ;;  %v92_v32 = vadd.f32 %v91_v31, %v35_v0  ;;  %p196_p11 = scmp.ne.s32.totalorder %s130_s24, %s195_s25  ;;  %p201_p13 = scmp.lt.s32.totalorder %s195_s25, %s195_s25 }
  0x2d   :  { %v72_v34 = vmul.f32 %v71_v18, %v69_v25  ;;  %v85_v35 = vand.u32 2147483647, %v84_v27  ;;  %v99_v36 = vstv %s280_s15  ;;  %v87_v38 = vstv %s283_s16 }
  0x2e   :  { %v57_v33 = vadd.f32 %v56_v24, %v49_v28  ;;  %v80_v37 = vmul.f32 %v79_v26, %v77_v30  ;;  %v100_v39 = vadd.f32 %v99_v36, %v35_v0  ;;  %v107_v40 = vstv %s285_s17  ;;  %p202_p0 = por %p201_p13, %p200_p12 }
  0x2f   :  { %v93_v42 = vand.u32 2147483647, %v92_v32  ;;  %v108_v43 = vadd.f32 %v107_v40, %v35_v0  ;;  %v115_v44 = vstv %s288_s18  ;;  %v95_v45 = vstv %s291_s19 }
  0x30   :  { %v65_v41 = vadd.f32 %v64_v29, %v57_v33  ;;  %v88_v47 = vmul.f32 %v87_v38, %v85_v35  ;;  %v101_v48 = vand.u32 2147483647, %v100_v39  ;;  %v116_v49 = vadd.f32 %v115_v44, %v35_v0  ;;  %p203_p1 = pnand %p202_p0, %p196_p11 }
  0x31   :  { %v103_v50 = vstv %s295_s20  ;;  %v96_v52 = vmul.f32 %v95_v45, %v93_v42  ;;  %v109_v53 = vand.u32 2147483647, %v108_v43  ;;  %v111_v54 = vstv %s157_s21 }
  0x32   :  { %v73_v46 = vadd.f32 %v72_v34, %v65_v41  ;;  %v104_v56 = vmul.f32 %v103_v50, %v101_v48  ;;  %v117_v57 = vand.u32 2147483647, %v116_v49  ;;  %v119_v58 = vstv %s159_s22 }
  0x33   :  { %v112_v60 = vmul.f32 %v111_v54, %v109_v53 }
  0x34   :  { %v81_v51 = vadd.f32 %v80_v37, %v73_v46  ;;  %v120_v62 = vmul.f32 %v119_v58, %v117_v57 }
  0x36   :  { %v89_v55 = vadd.f32 %v88_v47, %v81_v51 }
  0x38   :  { %v97_v59 = vadd.f32 %v96_v52, %v89_v55 }
  0x3a   :  { %v105_v61 = vadd.f32 %v104_v56, %v97_v59 }
  0x3c   :  { %v113_v63 = vadd.f32 %v112_v60, %v105_v61 }
  0x3e   :  { %v121_v1 = vadd.f32 %v120_v62, %v113_v63 }
  0x40   :  { %122 = vst [vmem:[#allocation7] sm:$0xff] %v121_v1 }
  0x41   :  { %206 = shalt.err (!%p203_p1)
}
  0x42   :  { %s207_s28 = scalar_lea.hbm %s318_s2, 128 }
  0x43   :  { %p208_p2 = scmp.ne.s32.totalorder %s318_s2, %s207_s28  ;;  %p211_p3 = scmp.lt.u32.totalorder %s207_s28, %s318_s2 }
  0x45   :  { %p213_p4 = pnand %p211_p3, %p208_p2 }
  0x47   :  { %216 = shalt.err (!%p213_p4)
}
  0x48   :  { %132 = dma.vmem_to_hbm [thread:$0]  %s130_s24, 128, %s318_s2, [#allocation4]  }
  0x49   :  { %221 = dma.done.wait [#allocation4], 128  }
  0x4a   :  { %222 = vsyncadd [#allocation4], 4294967168 }
  0x4b   :  { %136 = vsyncpa [#allocation3], 1 }
  0x4c   :  { %137 = vsyncpa [#allocation4], 1 }
  0x4d   :  { %138 = vsyncpa [#allocation5], 1 }

</bundles_post_ra>
